<compile_context>
chip_gen: v7x
topology: tpu7x:2x2x1
jax: 0.10.0
libtpu: 0.0.40
codegen_flags: <defaults>
</compile_context>

<pallas_src>
import jax
import jax.numpy as jnp
from jax.experimental import pallas as pl
from jax.experimental.pallas import tpu as pltpu


def _round_up(x, m):
    return ((x + m - 1) // m) * m


def _critic_kernel(xT_ref, w1T_ref, b1_ref, w2T_ref, b2_ref, w3_ref, b3_ref,
                   qT_ref):
    """Transposed 3-layer MLP; batch lives in the lane dimension.

    xT : (D_in, TM) compute dtype      w1T: (H, D_in) compute dtype
    b1 : (H, 1) f32                    w2T: (H, H)    compute dtype
    b2 : (H, 1) f32                    w3 : (H, 1)    f32
    b3 : (1, 1) f32  (SMEM scalar)     qT : (1, TM)   f32 (lane-dense)
    """
    # fc1: single K=D_in MXU pass (unsplit W1).
    h1 = jnp.dot(w1T_ref[...], xT_ref[...],
                 preferred_element_type=jnp.float32)
    h1 = jnp.maximum(h1 + b1_ref[...], 0.0)                 # f32 bias + ReLU

    # fc2
    h2 = jnp.dot(w2T_ref[...], h1.astype(w2T_ref.dtype),
                 preferred_element_type=jnp.float32)
    h2 = jnp.maximum(h2 + b2_ref[...], 0.0)

    # fc3: (H,1) weight -> VPU multiply + sublane reduction, no MXU pass.
    q = jnp.sum(h2 * w3_ref[...], axis=0, keepdims=True)    # (1, TM)
    qT_ref[...] = (q + b3_ref[0, 0]).astype(qT_ref.dtype)


def facmac_discrete_critic_forward(inputs, actions, params, obs_dim,
                                   n_actions, hidden_state=None, *,
                                   use_bf16=True, tm_max=8192):
    """Pure-JAX wrapper reproducing FACMACDiscreteCritic.forward.

    inputs : flattens to [-1, obs_dim] (or [-1, obs_dim+n_actions] if
             actions is None — passed through as ONE stream, never sliced).
    actions: flattens to [-1, n_actions] or None.
    use_bf16=True  -> bf16 MXU operands (f32 accumulate/bias/ReLU), ~1e-2
                      tolerance vs. the f32 torch module.
    use_bf16=False -> f32 end-to-end for tight parity.
    Returns (q [rows, 1] float32, hidden_state).
    """
    d_in = obs_dim + n_actions
    if actions is not None:
        x = jnp.concatenate([inputs.reshape(-1, obs_dim),
                             actions.reshape(-1, n_actions)], axis=-1)
    else:
        x = inputs.reshape(-1, d_in)            # single stream, no slicing
    B = x.shape[0]
    H = params["w2"].shape[0]

    cdt = jnp.bfloat16 if use_bf16 else jnp.float32

    # Feature-major ("batch in lanes") activation slab; XLA fuses the
    # concat + cast + transpose into one producer pass.
    xT = x.astype(cdt).T                                      # [D_in, B]

    w1T = params["w1"].T.astype(cdt)                          # [H, D_in]
    w2T = params["w2"].T.astype(cdt)                          # [H, H]
    w3 = params["w3"].reshape(-1, 1).astype(jnp.float32)      # [H, 1]
    b1 = params["b1"].reshape(-1, 1).astype(jnp.float32)      # [H, 1]
    b2 = params["b2"].reshape(-1, 1).astype(jnp.float32)      # [H, 1]
    b3 = params["b3"].reshape(1, 1).astype(jnp.float32)       # [1, 1] (SMEM)

    # ---- tile selection (lane dim => multiple of 128) ------------------
    nb = pl.cdiv(B, tm_max)
    if nb < 2 and B >= 256:
        nb = 2                       # give both v7x TensorCores a tile
    TM = _round_up(pl.cdiv(B, nb), 128)
    nb = pl.cdiv(B, TM)
    Bp = nb * TM
    if Bp != B:
        xT = jnp.pad(xT, ((0, 0), (0, Bp - B)))   # padded cols are discarded

    grid_spec = pl.GridSpec(
        grid=(nb,),
        in_specs=[
            pl.BlockSpec((d_in, TM), lambda i: (0, i)),        # activations
            pl.BlockSpec((H, d_in), lambda i: (0, 0)),         # W1^T (resident)
            pl.BlockSpec((H, 1), lambda i: (0, 0)),            # b1
            pl.BlockSpec((H, H), lambda i: (0, 0)),            # W2^T
            pl.BlockSpec((H, 1), lambda i: (0, 0)),            # b2
            pl.BlockSpec((H, 1), lambda i: (0, 0)),            # w3
            pl.BlockSpec(memory_space=pltpu.MemorySpace.SMEM),  # b3 scalar
        ],
        out_specs=pl.BlockSpec((1, TM), lambda i: (0, i)),     # lane-dense
    )

    # ---- true VMEM footprint (no lane padding on activations/output) ---
    itemsize = 2 if use_bf16 else 4
    in_tile = _round_up(d_in, 8) * TM * itemsize               # per buffer
    out_tile = 8 * TM * 4                                      # sublane pad
    interm = 2 * H * TM * 4                                    # h1, h2 (f32)
    weights = (H * _round_up(d_in, 128) + H * _round_up(H, 128)) * itemsize \
              + 3 * H * 128 * 4
    vmem_limit = 2 * (in_tile + out_tile) + interm + weights + (4 << 20)

    flops = 2 * Bp * (d_in * H + H * H + H)
    bytes_accessed = Bp * (d_in * itemsize + 4) + weights

    qT = pl.pallas_call(
        _critic_kernel,
        out_shape=jax.ShapeDtypeStruct((1, Bp), jnp.float32),
        grid_spec=grid_spec,
        compiler_params=pltpu.CompilerParams(
            dimension_semantics=("parallel",),      # megacore on v7x
            vmem_limit_bytes=int(min(vmem_limit, 100 << 20))),
        cost_estimate=pl.CostEstimate(flops=flops, transcendentals=0,
                                      bytes_accessed=int(bytes_accessed)),
    )(xT, w1T, b1, w2T, b2, w3, b3)

    q = qT[0, :B].reshape(B, 1)
    return q, hidden_state


if __name__ == "__main__":
    # Small shapes consistent with the module:
    #   scheme['obs']['vshape'] = 16, n_actions = 8 -> input_shape = 24
    #   args.rnn_hidden_dim = 32, args.n_agents = 3, batch = 2
    obs_dim, n_actions, hidden_dim = 16, 8, 32
    n_agents, batch = 3, 2
    d_in = obs_dim + n_actions

    key = jax.random.PRNGKey(0)
    k_obs, k_act, k1, k2, k3, kb1, kb2, kb3 = jax.random.split(key, 8)

    inputs = jax.random.normal(k_obs, (batch, n_agents, obs_dim), jnp.float32)
    actions = jax.random.normal(k_act, (batch, n_agents, n_actions),
                                jnp.float32)

    scale = 0.1
    params = {
        # Linear weights stored [in, out]; biases torch-style 1-D.
        "w1": scale * jax.random.normal(k1, (d_in, hidden_dim), jnp.float32),
        "b1": scale * jax.random.normal(kb1, (hidden_dim,), jnp.float32),
        "w2": scale * jax.random.normal(k2, (hidden_dim, hidden_dim),
                                        jnp.float32),
        "b2": scale * jax.random.normal(kb2, (hidden_dim,), jnp.float32),
        "w3": scale * jax.random.normal(k3, (hidden_dim, 1), jnp.float32),
        "b3": scale * jax.random.normal(kb3, (1,), jnp.float32),
    }

    # Pure-f32 JAX reference == the PyTorch module's forward.
    x_flat = jnp.concatenate([inputs.reshape(-1, obs_dim),
                              actions.reshape(-1, n_actions)], axis=-1)
    h1_r = jax.nn.relu(x_flat @ params["w1"] + params["b1"])
    h2_r = jax.nn.relu(h1_r @ params["w2"] + params["b2"])
    q_ref = h2_r @ params["w3"] + params["b3"]

    # f32 MXU path: tight parity with the torch module.
    q32, hid = facmac_discrete_critic_forward(inputs, actions, params,
                                              obs_dim, n_actions,
                                              use_bf16=False)
    q32 = jax.block_until_ready(q32)
    assert q32.shape == (batch * n_agents, 1)
    assert hid is None
    assert jnp.allclose(q32, q_ref, atol=5e-3, rtol=5e-3), "f32 path mismatch"

    # bf16 MXU path (default / perf): documented ~1e-2 tolerance vs f32.
    qbf, _ = facmac_discrete_critic_forward(inputs, actions, params,
                                            obs_dim, n_actions, use_bf16=True)
    qbf = jax.block_until_ready(qbf)
    assert jnp.allclose(qbf, q_ref, atol=3e-2, rtol=3e-2), "bf16 path mismatch"

    # actions=None path: pre-concatenated inputs, single stream, unsplit W1.
    qn, _ = facmac_discrete_critic_forward(x_flat, None, params,
                                           obs_dim, n_actions,
                                           use_bf16=False)
    qn = jax.block_until_ready(qn)
    assert jnp.allclose(qn, q_ref, atol=5e-3, rtol=5e-3), \
        "actions=None path mismatch"

    print("KERNEL_OK")
</pallas_src>

<mosaic_0001>
module attributes {stable_mosaic.version = 11 : i64} {
  func.func @_critic_kernel(%arg0: i32, %arg1: memref<24x128xf32, #tpu.memory_space<vmem>>, %arg2: memref<32x24xf32, #tpu.memory_space<vmem>>, %arg3: memref<32x1xf32, #tpu.memory_space<vmem>>, %arg4: memref<32x32xf32, #tpu.memory_space<vmem>>, %arg5: memref<32x1xf32, #tpu.memory_space<vmem>>, %arg6: memref<32x1xf32, #tpu.memory_space<vmem>>, %arg7: memref<1x1xf32, #tpu.memory_space<smem>>, %arg8: memref<1x128xf32, #tpu.memory_space<vmem>>) attributes {dimension_semantics = [#tpu.dimension_semantics<parallel>], iteration_bounds = array<i64: 1>, scalar_prefetch = 0 : i64, scratch_operands = 0 : i64, tpu.core_type = #tpu.core_type<tc>, window_params = [{transform_indices = @transform_0, window_bounds = array<i64: 24, 128>}, {pipeline_mode = #tpu.pipeline_mode<synchronous>, transform_indices = @transform_1, window_bounds = array<i64: 32, 24>}, {pipeline_mode = #tpu.pipeline_mode<synchronous>, transform_indices = @transform_2, window_bounds = array<i64: 32, 1>}, {pipeline_mode = #tpu.pipeline_mode<synchronous>, transform_indices = @transform_3, window_bounds = array<i64: 32, 32>}, {pipeline_mode = #tpu.pipeline_mode<synchronous>, transform_indices = @transform_4, window_bounds = array<i64: 32, 1>}, {pipeline_mode = #tpu.pipeline_mode<synchronous>, transform_indices = @transform_5, window_bounds = array<i64: 32, 1>}, {transform_indices = @transform_6, window_bounds = array<i64: 1, 1>}, {transform_indices = @transform_7, window_bounds = array<i64: 1, 128>}]} {
    %c0 = arith.constant 0 : index
    %c0_0 = arith.constant 0 : index
    %0 = vector.load %arg2[%c0, %c0_0] : memref<32x24xf32, #tpu.memory_space<vmem>>, vector<32x24xf32>
    %c0_1 = arith.constant 0 : index
    %c0_2 = arith.constant 0 : index
    %1 = vector.load %arg1[%c0_1, %c0_2] : memref<24x128xf32, #tpu.memory_space<vmem>>, vector<24x128xf32>
    %cst = arith.constant dense<0.000000e+00> : vector<32x128xf32>
    %2 = tpu.matmul %0, %1, %cst {dimension_numbers = #tpu.dot_dimension_numbers<[1], [0], [0], [1], [0, 0, 1, 1], [], []>} : vector<32x24xf32>, vector<24x128xf32>, vector<32x128xf32> -> vector<32x128xf32>
    %c0_3 = arith.constant 0 : index
    %c0_4 = arith.constant 0 : index
    %3 = vector.load %arg3[%c0_3, %c0_4] : memref<32x1xf32, #tpu.memory_space<vmem>>, vector<32x1xf32>
    %4 = vector.broadcast %3 : vector<32x1xf32> to vector<32x128xf32>
    %5 = arith.addf %2, %4 : vector<32x128xf32>
    %cst_5 = arith.constant 0.000000e+00 : f32
    %6 = vector.broadcast %cst_5 : f32 to vector<32x128xf32>
    %7 = arith.maximumf %5, %6 : vector<32x128xf32>
    %c0_6 = arith.constant 0 : index
    %c0_7 = arith.constant 0 : index
    %8 = vector.load %arg4[%c0_6, %c0_7] : memref<32x32xf32, #tpu.memory_space<vmem>>, vector<32x32xf32>
    %cst_8 = arith.constant dense<0.000000e+00> : vector<32x128xf32>
    %9 = tpu.matmul %8, %7, %cst_8 {dimension_numbers = #tpu.dot_dimension_numbers<[1], [0], [0], [1], [0, 0, 1, 1], [], []>} : vector<32x32xf32>, vector<32x128xf32>, vector<32x128xf32> -> vector<32x128xf32>
    %c0_9 = arith.constant 0 : index
    %c0_10 = arith.constant 0 : index
    %10 = vector.load %arg5[%c0_9, %c0_10] : memref<32x1xf32, #tpu.memory_space<vmem>>, vector<32x1xf32>
    %11 = vector.broadcast %10 : vector<32x1xf32> to vector<32x128xf32>
    %12 = arith.addf %9, %11 : vector<32x128xf32>
    %cst_11 = arith.constant 0.000000e+00 : f32
    %13 = vector.broadcast %cst_11 : f32 to vector<32x128xf32>
    %14 = arith.maximumf %12, %13 : vector<32x128xf32>
    %c0_12 = arith.constant 0 : index
    %c0_13 = arith.constant 0 : index
    %15 = vector.load %arg6[%c0_12, %c0_13] : memref<32x1xf32, #tpu.memory_space<vmem>>, vector<32x1xf32>
    %16 = vector.broadcast %15 : vector<32x1xf32> to vector<32x128xf32>
    %17 = arith.mulf %14, %16 : vector<32x128xf32>
    %cst_14 = arith.constant dense<0.000000e+00> : vector<128xf32>
    %18 = vector.multi_reduction <add>, %17, %cst_14 [0] : vector<32x128xf32> to vector<128xf32>
    %19 = vector.shape_cast %18 : vector<128xf32> to vector<1x128xf32>
    %c0_15 = arith.constant 0 : index
    %c0_16 = arith.constant 0 : index
    %20 = memref.load %arg7[%c0_15, %c0_16] : memref<1x1xf32, #tpu.memory_space<smem>>
    %21 = vector.broadcast %20 : f32 to vector<1x128xf32>
    %22 = arith.addf %19, %21 : vector<1x128xf32>
    %c0_17 = arith.constant 0 : index
    %c0_18 = arith.constant 0 : index
    %23 = vector.load %arg8[%c0_17, %c0_18] : memref<1x128xf32, #tpu.memory_space<vmem>>, vector<1x128xf32>
    tpu.vector_store %arg8[%c0_17, %c0_18], %22 {strides = array<i32>} : memref<1x128xf32, #tpu.memory_space<vmem>>, vector<1x128xf32>,
    return
  }
  func.func @transform_0(%arg0: i32) -> (i32, i32) {
    %c0_i32 = arith.constant 0 : i32
    %c0_i32_0 = arith.constant 0 : i32
    return %c0_i32, %arg0 : i32, i32
  }
  func.func @transform_1(%arg0: i32) -> (i32, i32) {
    %c0_i32 = arith.constant 0 : i32
    %c0_i32_0 = arith.constant 0 : i32
    %c0_i32_1 = arith.constant 0 : i32
    return %c0_i32, %c0_i32_0 : i32, i32
  }
  func.func @transform_2(%arg0: i32) -> (i32, i32) {
    %c0_i32 = arith.constant 0 : i32
    %c0_i32_0 = arith.constant 0 : i32
    %c0_i32_1 = arith.constant 0 : i32
    return %c0_i32, %c0_i32_0 : i32, i32
  }
  func.func @transform_3(%arg0: i32) -> (i32, i32) {
    %c0_i32 = arith.constant 0 : i32
    %c0_i32_0 = arith.constant 0 : i32
    %c0_i32_1 = arith.constant 0 : i32
    return %c0_i32, %c0_i32_0 : i32, i32
  }
  func.func @transform_4(%arg0: i32) -> (i32, i32) {
    %c0_i32 = arith.constant 0 : i32
    %c0_i32_0 = arith.constant 0 : i32
    %c0_i32_1 = arith.constant 0 : i32
    return %c0_i32, %c0_i32_0 : i32, i32
  }
  func.func @transform_5(%arg0: i32) -> (i32, i32) {
    %c0_i32 = arith.constant 0 : i32
    %c0_i32_0 = arith.constant 0 : i32
    %c0_i32_1 = arith.constant 0 : i32
    return %c0_i32, %c0_i32_0 : i32, i32
  }
  func.func @transform_6(%arg0: i32) -> (i32, i32) {
    %c0_i32 = arith.constant 0 : i32
    %c0_i32_0 = arith.constant 0 : i32
    %c0_i32_1 = arith.constant 0 : i32
    return %c0_i32, %c0_i32_0 : i32, i32
  }
  func.func @transform_7(%arg0: i32) -> (i32, i32) {
    %c0_i32 = arith.constant 0 : i32
    %c0_i32_0 = arith.constant 0 : i32
    return %c0_i32, %arg0 : i32, i32
  }
}

</mosaic_0001>

<bundles_post_ra>
// kernel: tpu_custom_call.1
= control target key start
LH: loop header
LB: loop body
LE: loop exit
PB: predicated region body
PF: predicated region fallthrough
CT: control target
= control target key end

     0   :  { %vm59_vm0 = vcmask 195584   ;;  %v435_v4 = vmov 0   ;;  %s569_s0 = inlined_call_operand.vmem [shape: f32[24,128], index: 0, kind: input, shape index: {}]   ;;  %s570_s1 = inlined_call_operand.vmem [shape: f32[32,24], index: 1, kind: input, shape index: {}]   ;;  %s571_s2 = inlined_call_operand.vmem [shape: f32[32,1], index: 2, kind: input, shape index: {}]   ;;  %s572_s3 = inlined_call_operand.vmem [shape: f32[32,32], index: 3, kind: input, shape index: {}]   ;;  %s573_s4 = inlined_call_operand.vmem [shape: f32[32,1], index: 4, kind: input, shape index: {}]   ;;  %s574_s5 = inlined_call_operand.vmem [shape: f32[32,1], index: 5, kind: input, shape index: {}]   ;;  %s575_s6 = inlined_call_operand.<no memory space> [shape: f32[1,1], index: 6, kind: input, shape index: {}]   ;;  %s576_s7 = inlined_call_operand.hbm [shape: f32[1,128], index: 7, kind: output, shape index: {}]  }
   0x1   :  { %v32_v0 = vld [vmem:[%s569_s0] sm:$0xff]  ;;  %v33_v1 = vld [vmem:[%s569_s0 + $0x8] sm:$0xff]  ;;  %409 = vset.pattern.permute.xlu0 %v435_v4  ;;  %410 = vset.pattern.permute.xlu1 %v435_v4  ;;  %v34_v5 = vld [vmem:[%s569_s0 + $0x10] sm:$0xff] }
   0x2   :  { %v395_v2 = vpack.c.bf16 %v33_v1, %v32_v0  ;;  %v28_v3 = vld [vmem:[%s570_s1] sm:$0xff]  ;;  %v37_v7 = vld [vmem:[%s571_s2 + $0x10] sm:$0xff]  ;;  %v36_v8 = vld [vmem:[%s571_s2 + $0x8] sm:$0xff] }
   0x3   :  { %375 = vmatprep.mubr.msk.f32.mxu0 %vm59_vm0, %v28_v3  ;;  %v35_v6 = vld [vmem:[%s571_s2] sm:$0xff]  ;;  %51 = vperm.xlu1 %410, %v37_v7   ;;  %v38_v9 = vld [vmem:[%s571_s2 + $0x18] sm:$0xff]  ;;  %v29_v10 = vld [vmem:[%s570_s1 + $0x8] sm:$0xff] }
   0x4   :  { %396 = vmatprep.subr.bf16.mxu0 %v395_v2  ;;  %41 = vperm.xlu0 %409, %v35_v6  }
   0x5   :  { %398 = vmatpush3.bf16.msra.mxu0 %v395_v2 }
   0x6   :  { %373 = vmatprep.subr.mxu0 %v34_v5 }
   0x7   :  { %13 = vsyncpa [#allocation4], 0  ;;  %v30_v11 = vld [vmem:[%s570_s1 + $0x10] sm:$0xff]  ;;  %56 = vperm.xlu1 %410, %v38_v9   ;;  %v165_v12 = vld [vmem:[%s573_s4] sm:$0xff]  ;;  %vm189_vm1 = vcmask 261120   ;;  %s436_s19 = smov [#allocation3]  }
   0x8   :  { %46 = vperm.xlu0 %409, %v36_v8   ;;  %v166_v13 = vld [vmem:[%s573_s4 + $0x8] sm:$0xff]  ;;  %v31_v14 = vld [vmem:[%s570_s1 + $0x18] sm:$0xff]  ;;  %v167_v15 = vld [vmem:[%s573_s4 + $0x10] sm:$0xff]  ;;  %s338_s20 = sshll.u32 %s436_s19, 4  ;;  %s339_s20 = int_to_ptr.vmem [resolvable:$true] %s338_s20 }
   0x9   :  { %374 = vmatpush3.msra.mxu0 %v34_v5  ;;  %v168_v16 = vld [vmem:[%s573_s4 + $0x18] sm:$0xff]  ;;  %v291_v17 = vld [vmem:[%s574_s5] sm:$0xff]  ;;  %v292_v18 = vld [vmem:[%s574_s5 + $0x8] sm:$0xff]  ;;  %s411_s21 = scalar_lea.vmem %s339_s20, 16  ;;  %s415_s22 = scalar_lea.vmem %s339_s20, 32 }
   0xa   :  { %376 = vmatmul.mubr.msk.f32.vlgmr.msra.gmra.mrb[0].mxu0 %vm59_vm0, %v29_v10  ;;  %v293_v19 = vld [vmem:[%s574_s5 + $0x10] sm:$0xff]  ;;  %v294_v20 = vld [vmem:[%s574_s5 + $0x18] sm:$0xff]  ;;  %v161_v21 = vld [vmem:[%s572_s3] sm:$0xff]  ;;  %p412_p0 = scmp.ne.s32.totalorder %s339_s20, %s411_s21  ;;  %p416_p1 = scmp.lt.s32.totalorder %s339_s20, %s339_s20 }
   0xb   :  { %378 = vmatprep.mubr.msk.f32.mxu0 %vm59_vm0, %v30_v11  ;;  %176 = vperm.xlu1 %410, %v166_v13   ;;  %v162_v40 = vld [vmem:[%s572_s3 + $0x8] sm:$0xff]  ;;  %v163_v41 = vld [vmem:[%s572_s3 + $0x10] sm:$0xff]  ;;  %v164_v42 = vld [vmem:[%s572_s3 + $0x18] sm:$0xff]  ;;  %v329_v11 = vstv %s575_s6  ;;  %p417_p2 = scmp.lt.s32.totalorder %s415_s22, %s411_s21 }
   0xc   :  { %171 = vperm.xlu0 %409, %v165_v12   ;;  %389 = vmatprep.mubr.msk.f32.mxu1 %vm189_vm1, %v161_v21 }
   0xd   :  { %p418_p3 = por %p417_p2, %p416_p1 }
   0xe   :  { %379 = vmatmul.mubr.msk.f32.gmra.mrb[2].mxu0 %vm59_vm0, %v31_v14 }
   0xf   :  { %186 = vperm.xlu1 %410, %v168_v16   ;;  %p419_p4 = pnand %p418_p3, %p412_p0 }
  0x10   :  { %181 = vperm.xlu0 %409, %v167_v15  }
  0x13   :  { %302 = vperm.xlu1 %410, %v292_v18  }
  0x14   :  { %297 = vperm.xlu0 %409, %v291_v17  }
  0x17   :  { %312 = vperm.xlu1 %410, %v294_v20  }
  0x18   :  { %307 = vperm.xlu0 %409, %v293_v19  }
  0x82   :  { %v52_v23 = vpop.permute.xlu1 %51 }
  0x83   :  { %v42_v22 = vpop.permute.xlu0 %41 }
  0x86   :  { %v57_v30 = vpop.permute.xlu1 %56 }
  0x87   :  { %v47_v24 = vpop.permute.xlu0 %46 }
  0x8a   :  { %v177_v44 = vpop.permute.xlu1 %176 }
  0x8b   :  { %v172_v43 = vpop.permute.xlu0 %171 }
  0x8e   :  { %v187_v46 = vpop.permute.xlu1 %186 }
  0x8f   :  { %v182_v45 = vpop.permute.xlu0 %181 }
  0x92   :  { %v303_v53 = vpop.permute.xlu1 %302 }
  0x93   :  { %v298_v51 = vpop.permute.xlu0 %297 }
  0x96   :  { %v313_v2 = vpop.permute.xlu1 %312 }
  0x97   :  { %v308_v0 = vpop.permute.xlu0 %307 }
  0xdd   :  { %v377_v25 = vpop.f32.mrb[0].mxu0 }
  0xde   :  { %v144_v26 = vadd.f32 %v377_v25, %v47_v24  ;;  %v138_v27 = vpop.f32.mrb[1].mxu0 }
  0xdf   :  { %v139_v28 = vadd.f32 %v138_v27, %v42_v22 }
  0xe0   :  { %v158_v29 = vmax.f32 %v144_v26, 0.0 }
  0xe1   :  { %v157_v31 = vmax.f32 %v139_v28, 0.0  ;;  %v380_v32 = vpop.f32.mrb[2].mxu0 }
  0xe2   :  { %v154_v33 = vadd.f32 %v380_v32, %v57_v30  ;;  %v148_v34 = vpop.f32.mrb[3].mxu0 }
  0xe3   :  { %v149_v35 = vadd.f32 %v148_v34, %v52_v23  ;;  %v399_v36 = vpack.c.bf16 %v158_v29, %v157_v31 }
  0xe4   :  { %v160_v37 = vmax.f32 %v154_v33, 0.0 }
  0xe5   :  { %v159_v38 = vmax.f32 %v149_v35, 0.0  ;;  %400 = vmatprep.subr.bf16.mxu1 %v399_v36 }
  0xe6   :  { %402 = vmatpush3.bf16.msra.mxu1 %v399_v36 }
  0xe7   :  { %v403_v39 = vpack.c.bf16 %v160_v37, %v159_v38 }
  0xe9   :  { %404 = vmatprep.subr.bf16.mxu1 %v403_v39 }
  0xea   :  { %406 = vmatpush3.bf16.msra.mxu1 %v403_v39 }
  0xed   :  { %390 = vmatmul.mubr.msk.f32.vlgmr.msra.gmra.mrb[0].mxu1 %vm189_vm1, %v162_v40 }
  0xee   :  { %392 = vmatprep.mubr.msk.f32.mxu1 %vm189_vm1, %v163_v41 }
  0xf1   :  { %393 = vmatmul.mubr.msk.f32.gmra.mrb[2].mxu1 %vm189_vm1, %v164_v42 }
 0x1c0   :  { %v391_v47 = vpop.f32.mrb[0].mxu1 }
 0x1c1   :  { %v274_v48 = vadd.f32 %v391_v47, %v177_v44  ;;  %v268_v49 = vpop.f32.mrb[1].mxu1 }
 0x1c2   :  { %v269_v50 = vadd.f32 %v268_v49, %v172_v43 }
 0x1c3   :  { %v288_v52 = vmax.f32 %v274_v48, 0.0 }
 0x1c4   :  { %v287_v54 = vmax.f32 %v269_v50, 0.0  ;;  %v394_v55 = vpop.f32.mrb[2].mxu1 }
 0x1c5   :  { %v316_v56 = vmul.f32 %v303_v53, %v288_v52  ;;  %v284_v57 = vadd.f32 %v394_v55, %v187_v46  ;;  %v278_v58 = vpop.f32.mrb[3].mxu1 }
 0x1c6   :  { %v315_v59 = vmul.f32 %v298_v51, %v287_v54  ;;  %v279_v60 = vadd.f32 %v278_v58, %v182_v45 }
 0x1c7   :  { %v290_v62 = vmax.f32 %v284_v57, 0.0 }
 0x1c8   :  { %v319_v61 = vadd.f32 %v316_v56, %v315_v59  ;;  %v289_v63 = vmax.f32 %v279_v60, 0.0 }
 0x1c9   :  { %v318_v3 = vmul.f32 %v313_v2, %v290_v62 }
 0x1ca   :  { %v317_v1 = vmul.f32 %v308_v0, %v289_v63 }
 0x1cc   :  { %v320_v4 = vadd.f32 %v319_v61, %v317_v1 }
 0x1ce   :  { %v321_v5 = vadd.f32 %v320_v4, %v318_v3 }
 0x1d0   :  { %v322_v6 = vrot.slane %v321_v5, 4 }
 0x1d2   :  { %v323_v7 = vadd.f32 %v322_v6, %v321_v5 }
 0x1d4   :  { %v324_v8 = vrot.slane %v323_v7, 2 }
 0x1d6   :  { %v325_v9 = vadd.f32 %v324_v8, %v323_v7 }
 0x1d8   :  { %v326_v10 = vrot.slane %v325_v9, 1 }
 0x1da   :  { %v327_v12 = vadd.f32 %v326_v10, %v325_v9 }
 0x1dc   :  { %v330_v13 = vadd.f32 %v329_v11, %v327_v12 }
 0x1de   :  { %331 = vst [vmem:[#allocation3] sm:$0x1] %v330_v13 }
 0x1df   :  { %422 = shalt.err (!%p419_p4)
}
 0x1e0   :  { %s423_s24 = scalar_lea.hbm %s576_s7, 16 }
 0x1e1   :  { %p424_p5 = scmp.ne.s32.totalorder %s576_s7, %s423_s24  ;;  %p427_p6 = scmp.lt.u32.totalorder %s423_s24, %s576_s7 }
 0x1e3   :  { %p429_p7 = pnand %p427_p6, %p424_p5 }
 0x1e5   :  { %432 = shalt.err (!%p429_p7)
}
 0x1e6   :  { %341 = dma.vmem_to_hbm [thread:$0]  %s339_s20, 16, %s576_s7, [#allocation4]  }
 0x1e7   :  { %433 = dma.done.wait [#allocation4], 16  }
 0x1e8   :  { %434 = vsyncadd [#allocation4], 4294967280 }
 0x1e9   :  { %345 = vsyncpa [#allocation4], 1 }

</bundles_post_ra>
